<compile_context>
chip_gen: v5e
topology: v5e:2x2
jax: 0.10.0
libtpu: 0.0.40
codegen_flags: <defaults>
</compile_context>

<pallas_src>
import jax
import jax.numpy as jnp
from jax.experimental import pallas as pl
from jax.experimental.pallas import tpu as pltpu

SUBLANE = 8  # sublane width (second-to-last dim granularity)


def _round_up(x, m):
    return ((x + m - 1) // m) * m


def ac_policy_mean_kernel(obs_ref, w1_ref, b1_ref, w2_ref, b2_ref,
                          w3_ref, b3_ref, mean_ref):
    # Layer 1: Linear + Tanh
    h1 = jnp.tanh(
        jnp.dot(obs_ref[...], w1_ref[...], preferred_element_type=jnp.float32)
        + b1_ref[...]
    )
    # Layer 2: Linear + Tanh
    h2 = jnp.tanh(
        jnp.dot(h1, w2_ref[...], preferred_element_type=jnp.float32)
        + b2_ref[...]
    )
    # Output layer: Linear (action mean)
    mean_ref[...] = (
        jnp.dot(h2, w3_ref[...], preferred_element_type=jnp.float32)
        + b3_ref[...]
    )


def _ac_policy_forward(obs, params, *, block_b=2048):
    """Returns (mean, std) of the Gaussian policy distribution."""
    w1, b1, w2, b2, w3, b3, log_std = params
    B, obs_dim = obs.shape
    hidden = w1.shape[1]
    act_dim = w3.shape[1]
    f32 = jnp.float32

    # Batch tiling: tile is a multiple of 8 sublanes; prefer >= 2 grid steps so
    # dimension_semantics=("parallel",) can shard the batch across v7x's 2 TCs.
    TB = min(block_b, _round_up(B, SUBLANE))
    BP = _round_up(B, TB)
    if BP // TB < 2 and TB > SUBLANE:
        TB = max(SUBLANE, _round_up(TB // 2, SUBLANE))
        BP = _round_up(B, TB)

    # Only the batch (row) axis may need padding; feature dims stay unpadded.
    obs_f = obs.astype(f32)
    if BP != B:
        obs_p = jnp.zeros((BP, obs_dim), f32).at[:B].set(obs_f)
    else:
        obs_p = obs_f

    grid = (pl.cdiv(BP, TB),)
    const2 = lambda i: (0, 0)     # weight / bias blocks are grid-invariant

    mean_p = pl.pallas_call(
        ac_policy_mean_kernel,
        out_shape=jax.ShapeDtypeStruct((BP, act_dim), f32),
        grid=grid,
        in_specs=[
            pl.BlockSpec((TB, obs_dim), lambda i: (i, 0)),   # obs: tiled over batch
            pl.BlockSpec((obs_dim, hidden), const2),         # w1 (VMEM-resident)
            pl.BlockSpec((1, hidden), const2),               # b1
            pl.BlockSpec((hidden, hidden), const2),          # w2
            pl.BlockSpec((1, hidden), const2),               # b2
            pl.BlockSpec((hidden, act_dim), const2),         # w3
            pl.BlockSpec((1, act_dim), const2),              # b3
        ],
        out_specs=pl.BlockSpec((TB, act_dim), lambda i: (i, 0)),
        compiler_params=pltpu.CompilerParams(
            dimension_semantics=("parallel",),               # use both TCs on v7x
        ),
    )(obs_p, w1, b1, w2, b2, w3, b3)

    mean = mean_p[:B] if BP != B else mean_p
    # std = exp(log_std) is batch-invariant -> computed outside the kernel.
    std = jnp.broadcast_to(jnp.exp(log_std), mean.shape)
    return mean, std


# jit the wrapper so the (rare) row pad, row slice, and std broadcast fuse
# with the pallas_call instead of being separate eager dispatches.
ac_policy_forward = jax.jit(_ac_policy_forward, static_argnames=("block_b",))


def init_params(key, obs_dim, hidden, act_dim):
    k1, k2, k3 = jax.random.split(key, 3)
    scale1 = 1.0 / jnp.sqrt(obs_dim)
    scale2 = 1.0 / jnp.sqrt(hidden)
    w1 = jax.random.uniform(k1, (obs_dim, hidden), jnp.float32, -scale1, scale1)
    b1 = jnp.zeros((1, hidden), jnp.float32)
    w2 = jax.random.uniform(k2, (hidden, hidden), jnp.float32, -scale2, scale2)
    b2 = jnp.zeros((1, hidden), jnp.float32)
    w3 = jax.random.uniform(k3, (hidden, act_dim), jnp.float32, -scale2, scale2)
    b3 = jnp.zeros((1, act_dim), jnp.float32)
    # nn.Parameter(torch.zeros(act_dim)) — log_std starts at zero => std = 1
    log_std = jnp.zeros((1, act_dim), jnp.float32)
    return (w1, b1, w2, b2, w3, b3, log_std)


if __name__ == "__main__":
    key = jax.random.PRNGKey(0)
    k_obs, k_params = jax.random.split(key)

    B, OBS_DIM, HIDDEN, ACT_DIM = 8, 16, 32, 8
    obs = jax.random.normal(k_obs, (B, OBS_DIM), jnp.float32)
    params = init_params(k_params, OBS_DIM, HIDDEN, ACT_DIM)

    mean, std = ac_policy_forward(obs, params)
    jax.block_until_ready((mean, std))

    # Reference check in plain JAX (same semantics as mean_net + log_std.exp()).
    w1, b1, w2, b2, w3, b3, log_std = params
    h1 = jnp.tanh(obs @ w1 + b1)
    h2 = jnp.tanh(h1 @ w2 + b2)
    mean_ref = h2 @ w3 + b3
    std_ref = jnp.broadcast_to(jnp.exp(log_std), mean_ref.shape)
    assert mean.shape == (B, ACT_DIM) and std.shape == (B, ACT_DIM)
    assert jnp.allclose(mean, mean_ref, atol=1e-5), "mean mismatch"
    assert jnp.allclose(std, std_ref, atol=1e-6), "std mismatch"

    print("KERNEL_OK")
</pallas_src>

<mosaic_0001>
module attributes {stable_mosaic.version = 11 : i64} {
  func.func @ac_policy_mean_kernel(%arg0: i32, %arg1: memref<8x16xf32, #tpu.memory_space<vmem>>, %arg2: memref<16x32xf32, #tpu.memory_space<vmem>>, %arg3: memref<1x32xf32, #tpu.memory_space<vmem>>, %arg4: memref<32x32xf32, #tpu.memory_space<vmem>>, %arg5: memref<1x32xf32, #tpu.memory_space<vmem>>, %arg6: memref<32x8xf32, #tpu.memory_space<vmem>>, %arg7: memref<1x8xf32, #tpu.memory_space<vmem>>, %arg8: memref<8x8xf32, #tpu.memory_space<vmem>>) attributes {dimension_semantics = [#tpu.dimension_semantics<parallel>], iteration_bounds = array<i64: 1>, scalar_prefetch = 0 : i64, scratch_operands = 0 : i64, tpu.core_type = #tpu.core_type<tc>, window_params = [{transform_indices = @transform_0, window_bounds = array<i64: 8, 16>}, {pipeline_mode = #tpu.pipeline_mode<synchronous>, transform_indices = @transform_1, window_bounds = array<i64: 16, 32>}, {pipeline_mode = #tpu.pipeline_mode<synchronous>, transform_indices = @transform_2, window_bounds = array<i64: 1, 32>}, {pipeline_mode = #tpu.pipeline_mode<synchronous>, transform_indices = @transform_3, window_bounds = array<i64: 32, 32>}, {pipeline_mode = #tpu.pipeline_mode<synchronous>, transform_indices = @transform_4, window_bounds = array<i64: 1, 32>}, {pipeline_mode = #tpu.pipeline_mode<synchronous>, transform_indices = @transform_5, window_bounds = array<i64: 32, 8>}, {pipeline_mode = #tpu.pipeline_mode<synchronous>, transform_indices = @transform_6, window_bounds = array<i64: 1, 8>}, {transform_indices = @transform_7, window_bounds = array<i64: 8, 8>}]} {
    %c0 = arith.constant 0 : index
    %c0_0 = arith.constant 0 : index
    %0 = vector.load %arg1[%c0, %c0_0] : memref<8x16xf32, #tpu.memory_space<vmem>>, vector<8x16xf32>
    %c0_1 = arith.constant 0 : index
    %c0_2 = arith.constant 0 : index
    %1 = vector.load %arg2[%c0_1, %c0_2] : memref<16x32xf32, #tpu.memory_space<vmem>>, vector<16x32xf32>
    %cst = arith.constant dense<0.000000e+00> : vector<8x32xf32>
    %2 = tpu.matmul %0, %1, %cst {dimension_numbers = #tpu.dot_dimension_numbers<[1], [0], [0], [1], [0, 0, 1, 1], [], []>} : vector<8x16xf32>, vector<16x32xf32>, vector<8x32xf32> -> vector<8x32xf32>
    %c0_3 = arith.constant 0 : index
    %c0_4 = arith.constant 0 : index
    %3 = vector.load %arg3[%c0_3, %c0_4] : memref<1x32xf32, #tpu.memory_space<vmem>>, vector<1x32xf32>
    %4 = vector.broadcast %3 : vector<1x32xf32> to vector<8x32xf32>
    %5 = arith.addf %2, %4 : vector<8x32xf32>
    %6 = math.tanh %5 : vector<8x32xf32>
    %c0_5 = arith.constant 0 : index
    %c0_6 = arith.constant 0 : index
    %7 = vector.load %arg4[%c0_5, %c0_6] : memref<32x32xf32, #tpu.memory_space<vmem>>, vector<32x32xf32>
    %cst_7 = arith.constant dense<0.000000e+00> : vector<8x32xf32>
    %8 = tpu.matmul %6, %7, %cst_7 {dimension_numbers = #tpu.dot_dimension_numbers<[1], [0], [0], [1], [0, 0, 1, 1], [], []>} : vector<8x32xf32>, vector<32x32xf32>, vector<8x32xf32> -> vector<8x32xf32>
    %c0_8 = arith.constant 0 : index
    %c0_9 = arith.constant 0 : index
    %9 = vector.load %arg5[%c0_8, %c0_9] : memref<1x32xf32, #tpu.memory_space<vmem>>, vector<1x32xf32>
    %10 = vector.broadcast %9 : vector<1x32xf32> to vector<8x32xf32>
    %11 = arith.addf %8, %10 : vector<8x32xf32>
    %12 = math.tanh %11 : vector<8x32xf32>
    %c0_10 = arith.constant 0 : index
    %c0_11 = arith.constant 0 : index
    %13 = vector.load %arg6[%c0_10, %c0_11] : memref<32x8xf32, #tpu.memory_space<vmem>>, vector<32x8xf32>
    %cst_12 = arith.constant dense<0.000000e+00> : vector<8x8xf32>
    %14 = tpu.matmul %12, %13, %cst_12 {dimension_numbers = #tpu.dot_dimension_numbers<[1], [0], [0], [1], [0, 0, 1, 1], [], []>} : vector<8x32xf32>, vector<32x8xf32>, vector<8x8xf32> -> vector<8x8xf32>
    %c0_13 = arith.constant 0 : index
    %c0_14 = arith.constant 0 : index
    %15 = vector.load %arg7[%c0_13, %c0_14] : memref<1x8xf32, #tpu.memory_space<vmem>>, vector<1x8xf32>
    %16 = vector.broadcast %15 : vector<1x8xf32> to vector<8x8xf32>
    %17 = arith.addf %14, %16 : vector<8x8xf32>
    %c0_15 = arith.constant 0 : index
    %c0_16 = arith.constant 0 : index
    %18 = vector.load %arg8[%c0_15, %c0_16] : memref<8x8xf32, #tpu.memory_space<vmem>>, vector<8x8xf32>
    tpu.vector_store %arg8[%c0_15, %c0_16], %17 {strides = array<i32>} : memref<8x8xf32, #tpu.memory_space<vmem>>, vector<8x8xf32>,
    return
  }
  func.func @transform_0(%arg0: i32) -> (i32, i32) {
    %c0_i32 = arith.constant 0 : i32
    %c0_i32_0 = arith.constant 0 : i32
    return %arg0, %c0_i32 : i32, i32
  }
  func.func @transform_1(%arg0: i32) -> (i32, i32) {
    %c0_i32 = arith.constant 0 : i32
    %c0_i32_0 = arith.constant 0 : i32
    %c0_i32_1 = arith.constant 0 : i32
    return %c0_i32, %c0_i32_0 : i32, i32
  }
  func.func @transform_2(%arg0: i32) -> (i32, i32) {
    %c0_i32 = arith.constant 0 : i32
    %c0_i32_0 = arith.constant 0 : i32
    %c0_i32_1 = arith.constant 0 : i32
    return %c0_i32, %c0_i32_0 : i32, i32
  }
  func.func @transform_3(%arg0: i32) -> (i32, i32) {
    %c0_i32 = arith.constant 0 : i32
    %c0_i32_0 = arith.constant 0 : i32
    %c0_i32_1 = arith.constant 0 : i32
    return %c0_i32, %c0_i32_0 : i32, i32
  }
  func.func @transform_4(%arg0: i32) -> (i32, i32) {
    %c0_i32 = arith.constant 0 : i32
    %c0_i32_0 = arith.constant 0 : i32
    %c0_i32_1 = arith.constant 0 : i32
    return %c0_i32, %c0_i32_0 : i32, i32
  }
  func.func @transform_5(%arg0: i32) -> (i32, i32) {
    %c0_i32 = arith.constant 0 : i32
    %c0_i32_0 = arith.constant 0 : i32
    %c0_i32_1 = arith.constant 0 : i32
    return %c0_i32, %c0_i32_0 : i32, i32
  }
  func.func @transform_6(%arg0: i32) -> (i32, i32) {
    %c0_i32 = arith.constant 0 : i32
    %c0_i32_0 = arith.constant 0 : i32
    %c0_i32_1 = arith.constant 0 : i32
    return %c0_i32, %c0_i32_0 : i32, i32
  }
  func.func @transform_7(%arg0: i32) -> (i32, i32) {
    %c0_i32 = arith.constant 0 : i32
    %c0_i32_0 = arith.constant 0 : i32
    return %arg0, %c0_i32 : i32, i32
  }
}

</mosaic_0001>

<bundles_post_ra>
// kernel: _ac_policy_forward.1
= control target key start
LH: loop header
LB: loop body
LE: loop exit
PB: predicated region body
PF: predicated region fallthrough
CT: control target
= control target key end

     0   :  { %12 = vsyncpa [#allocation3], 0  ;;  %s394_s0 = inlined_call_operand.vmem [shape: f32[8,16], index: 0, kind: input, shape index: {}]   ;;  %s395_s1 = inlined_call_operand.hbm [shape: f32[16,32], index: 1, kind: input, shape index: {}]   ;;  %s396_s2 = inlined_call_operand.vmem [shape: f32[1,32], index: 2, kind: input, shape index: {}]   ;;  %s397_s3 = inlined_call_operand.vmem [shape: f32[32,32], index: 3, kind: input, shape index: {}]   ;;  %s398_s4 = inlined_call_operand.hbm [shape: f32[1,32], index: 4, kind: input, shape index: {}]   ;;  %s399_s5 = inlined_call_operand.vmem [shape: f32[32,8], index: 5, kind: input, shape index: {}]   ;;  %s400_s6 = inlined_call_operand.hbm [shape: f32[1,8], index: 6, kind: input, shape index: {}]   ;;  %s401_s7 = inlined_call_operand.hbm [shape: f32[8,8], index: 7, kind: output, shape index: {}]  }
   0x1   :  { %13 = vsyncpa [#allocation6], 0  ;;  %s39_s26 = sshll.u32 %s398_s4, 4  ;;  %s40_s26 = int_to_ptr.hbm [resolvable:$true] %s39_s26 }
   0x2   :  { %14 = vsyncpa [#allocation4], 0  ;;  %s304_s27 = smov [#allocation5]   ;;  %s21_s8 = sshll.u32 %s395_s1, 4  ;;  %s22_s8 = int_to_ptr.hbm [resolvable:$true] %s21_s8 }
   0x3   :  { %s41_s28 = sshll.u32 %s304_s27, 4  ;;  %s305_s9 = smov [#allocation2]   ;;  %s42_s28 = int_to_ptr.vmem [resolvable:$true] %s41_s28 }
   0x4   :  { %44 = dma.hbm_to_vmem [thread:$0]  %s40_s26, 16, %s42_s28, [#allocation6]  }
   0x5   :  { %s23_s10 = sshll.u32 %s305_s9, 4  ;;  %s306_s11 = smov 128   ;;  %s24_s10 = int_to_ptr.vmem [resolvable:$true] %s23_s10 }
   0x6   :  { %s307_s12 = smov 8   ;;  %s52_s4 = sshll.u32 %s400_s6, 4  ;;  %s53_s4 = int_to_ptr.hbm [resolvable:$true] %s52_s4 }
   0x7   :  { %29 = dma.hbm_to_vmem [thread:$0]  %s22_s8, 256, %s24_s10, [#allocation3], %s306_s11, %s306_s11, %s307_s12  }
   0x8   :  { %s308_s15 = smov [#allocation7]  }
   0x9   :  { %s54_s16 = sshll.u32 %s308_s15, 4  ;;  %s55_s16 = int_to_ptr.vmem [resolvable:$true] %s54_s16 }
   0xa   :  { %57 = dma.hbm_to_vmem [thread:$0]  %s53_s4, 16, %s55_s16, [#allocation6]  }
   0xb   :  { %298 = dma.done.wait [#allocation3], 256  }
   0xc   :  { %299 = vsyncadd [#allocation3], 4294967040 }
   0xd   :  { %300 = dma.done.wait [#allocation6], 32  }
   0xe   :  { %301 = vsyncadd [#allocation6], 4294967264  ;;  %v72_v0 = vld [vmem:[#allocation2 + $0x8] sm:$0xff]  ;;  %v71_v1 = vld [vmem:[#allocation2] sm:$0xff]  ;;  %vm77_vm0 = vcmask 130048   ;;  %vm110_vm1 = vcmask 261120  }
   0xf   :  { %95 = vmatpush.msra.mxu0 %v72_v0  ;;  %v70_v2 = vld [vmem:[%s394_s0] sm:$0xff]  ;;  %v105_v3 = vld [vmem:[%s397_s3 + $0x18] sm:$0xff]  ;;  %v104_v4 = vld [vmem:[%s397_s3 + $0x10] sm:$0xff]  ;;  %s309_s9 = smov [#allocation8]   ;;  %s175_s13 = sshll.u32 %s401_s7, 4  ;;  %vm166_vm2 = vcmask 64512   ;;  %s176_s13 = int_to_ptr.hbm [resolvable:$true] %s175_s13 }
  0x10   :  { %126 = vmatpush.msra.mxu1 %v105_v3  ;;  %v103_v5 = vld [vmem:[%s397_s3 + $0x8] sm:$0xff]  ;;  %v102_v6 = vld [vmem:[%s397_s3] sm:$0xff]  ;;  %v138_v11 = vld [vmem:[%s399_s5 + $0x18] sm:$0xff]  ;;  %s173_s10 = sshll.u32 %s309_s9, 4  ;;  %s174_s10 = int_to_ptr.vmem [resolvable:$true] %s173_s10 }
  0x11   :  { %96 = vmatpush.msra.mxu0 %v71_v1  ;;  %v195_v7 = vld [vmem:[%s396_s2] ss:$0 sm:$0xff]  ;;  %158 = vmatpush.msra.mxu2 %v138_v11  ;;  %v137_v12 = vld [vmem:[%s399_s5 + $0x10] sm:$0xff]  ;;  %v136_v13 = vld [vmem:[%s399_s5 + $0x8] sm:$0xff] }
  0x12   :  { %186 = vmatmul.msk.f32.vlgmr.msra.gmra.mxu0 %vm77_vm0, %v70_v2  ;;  %127 = vmatpush.msra.mxu1 %v104_v4  ;;  %v135_v14 = vld [vmem:[%s399_s5] sm:$0xff]  ;;  %v196_v15 = vld [vmem:[#allocation5] ss:$0 sm:$0xff]  ;;  %v197_v19 = vld [vmem:[#allocation7] ss:$0 sm:$0xff] }
  0x13   :  { %159 = vmatpush.msra.mxu2 %v137_v12 }
  0x14   :  { %128 = vmatpush.msra.mxu1 %v103_v5 }
  0x15   :  { %160 = vmatpush.msra.mxu2 %v136_v13 }
  0x16   :  { %129 = vmatpush.msra.mxu1 %v102_v6 }
  0x17   :  { %161 = vmatpush.msra.mxu2 %v135_v14 }
  0x8f   :  { %v98_v8 = vpop.f32.mrf.mxu0 }
  0x90   :  { %v99_v9 = vadd.f32 %v195_v7, %v98_v8 }
  0x92   :  { %198 = vtanh.f32 %v99_v9 }
  0x98   :  { %v199_v10 = vpop.eup %198 }
  0x99   :  { %187 = vmatmul.msk.f32.vlgmr.msra.gmra.mxu1 %vm110_vm1, %v199_v10 }
 0x116   :  { %v131_v16 = vpop.f32.mrf.mxu1 }
 0x117   :  { %v132_v17 = vadd.f32 %v196_v15, %v131_v16 }
 0x119   :  { %200 = vtanh.f32 %v132_v17 }
 0x11f   :  { %v201_v18 = vpop.eup %200 }
 0x120   :  { %188 = vmatmul.msk.f32.vlgmr.msra.gmra.mxu2 %vm110_vm1, %v201_v18 }
 0x1a3   :  { %v163_v20 = vpop.f32.mrf.mxu2 }
 0x1a4   :  { %v164_v21 = vadd.f32 %v197_v19, %v163_v20 }
 0x1a6   :  { %167 = vst.msk [vmem:[#allocation8] sm:$0xff] %vm166_vm2, %v164_v21 }
 0x1a7   :  { %178 = dma.vmem_to_hbm [thread:$0]  %s174_s10, 128, %s176_s13, [#allocation4]  }
 0x1a8   :  { %302 = dma.done.wait [#allocation4], 128  }
 0x1a9   :  { %303 = vsyncadd [#allocation4], 4294967168 }
 0x1aa   :  { %183 = vsyncpa [#allocation3], 1 }
 0x1ab   :  { %184 = vsyncpa [#allocation6], 1 }
 0x1ac   :  { %185 = vsyncpa [#allocation4], 1 }

</bundles_post_ra>
